<compile_context>
chip_gen: v7x
topology: tpu7x:2x2x1
jax: 0.10.0
libtpu: 0.0.40
codegen_flags: <defaults>
</compile_context>

<pallas_src>
import functools

import jax
import jax.numpy as jnp
from jax import lax
from jax.experimental import pallas as pl
from jax.experimental.pallas import tpu as pltpu


def _round_up(n, m):
    return ((n + m - 1) // m) * m


def _pad_to(a, shape):
    """Zero-pad `a` up to `shape` (trailing pads only); no copy if already there."""
    if tuple(a.shape) == tuple(shape):
        return a
    widths = [(0, t - s) for s, t in zip(a.shape, shape)]
    return jnp.pad(a, widths)


def _rnn_recurrence_kernel(p_ref, h0_ref, whh_t_ref, out_ref, h_scratch):
    """One grid step = one (batch-tile, time-chunk).

    p_ref:     (C, Bt, Hp) fp32   precomputed x_t @ W_ih^T + b_ih + b_hh
    h0_ref:    (Bt, Hp)    fp32   initial hidden state (read only at chunk t == 0)
    whh_t_ref: (Hp, Hp)           W_hh^T (bf16 or fp32), single-buffered
    out_ref:   (C, Bt, Hp)        hidden states for this chunk (caller dtype)
    h_scratch: (Bt, Hp)    fp32   hidden state carried across time chunks
    """
    t = pl.program_id(1)  # time-chunk index (batch tile is grid axis 0)

    @pl.when(t == 0)
    def _():
        h_scratch[...] = h0_ref[...].astype(jnp.float32)

    C = p_ref.shape[0]

    # Serial recurrence over the C timesteps of this chunk, fully unrolled so the
    # LLO scheduler sees the whole chunk.  ReLU/add stay in fp32 (VPU-legal on
    # all of v5e/v6e/v7x); only the matmul operands are (optionally) bf16.
    # TODO(synk): for large H, hold W_hh^T staged in the MXU across the chunk
    # via pltpu.matmul_push_rhs / matmul_acc_lhs / matmul_pop instead of
    # re-staging it inside jnp.dot every timestep (verify Mosaic isn't already
    # hoisting the weight push via the bundle dump first).
    def step(c, h):
        pre = p_ref[c] + jnp.dot(
            h.astype(whh_t_ref.dtype), whh_t_ref[...],
            preferred_element_type=jnp.float32,
        )
        h_new = jnp.maximum(pre, 0.0)
        out_ref[c] = h_new.astype(out_ref.dtype)
        return h_new

    h_final = lax.fori_loop(0, C, step, h_scratch[...], unroll=True)
    h_scratch[...] = h_final


@functools.partial(
    jax.jit, static_argnames=("chunk", "batch_tile", "use_bf16_matmul"))
def simple_rnn_n(x, weight_ih, weight_hh, bias_ih, bias_hh, hx=None,
                 chunk=32, batch_tile=None, use_bf16_matmul=True):
    """x: (T, B, D_in). Returns (output (T, B, H), final hidden (B, H))."""
    T, B, D = x.shape
    H = weight_ih.shape[0]
    dtype = x.dtype
    if hx is None:
        hx = jnp.zeros((B, H), dtype=dtype)

    w_dtype = jnp.bfloat16 if use_bf16_matmul else jnp.float32

    # ---- Input projection, hoisted completely off the serial path: one big
    # parallel matmul (full MXU fill / both v7x cores), fp32 accumulation.
    bias = (bias_ih + bias_hh).astype(jnp.float32)
    proj = jnp.dot(
        x.reshape(T * B, D).astype(w_dtype), weight_ih.T.astype(w_dtype),
        preferred_element_type=jnp.float32)
    proj = (proj + bias[None, :]).reshape(T, B, H)

    # ---- Tiling: pad only the axes that need it (sublane x8, lane x128).
    Hp = _round_up(H, 128)
    Bt = batch_tile if batch_tile is not None else min(_round_up(B, 8), 64)
    Bt = _round_up(Bt, 8)
    Bp = _round_up(B, Bt)
    C = min(chunk, T)
    Tp = _round_up(T, C)

    proj_p = _pad_to(proj, (Tp, Bp, Hp))
    h0_p = _pad_to(hx.astype(jnp.float32), (Bp, Hp))
    whh_t = _pad_to(weight_hh.T.astype(w_dtype), (Hp, Hp))

    # ---- Explicit VMEM budget (only set when the estimate gets large; default
    # scoped limit is plenty for small shapes).
    out_isz = jnp.dtype(dtype).itemsize
    w_isz = jnp.dtype(w_dtype).itemsize
    vmem_need = (2 * C * Bt * Hp * 4          # P blocks (double-buffered)
                 + 2 * C * Bt * Hp * out_isz  # out blocks (double-buffered)
                 + 2 * Bt * Hp * 4            # h0 blocks
                 + 1 * Hp * Hp * w_isz        # W_hh^T (single-buffered)
                 + Bt * Hp * 4)               # carried-h scratch
    vmem_limit = int(vmem_need * 1.5) if vmem_need > (24 << 20) else None

    out_p = pl.pallas_call(
        _rnn_recurrence_kernel,
        out_shape=jax.ShapeDtypeStruct((Tp, Bp, Hp), dtype),
        grid_spec=pltpu.PrefetchScalarGridSpec(
            num_scalar_prefetch=0,
            grid=(Bp // Bt, Tp // C),  # (batch tiles, time chunks)
            in_specs=[
                pl.BlockSpec((C, Bt, Hp), lambda b, t: (t, b, 0)),   # P chunk
                pl.BlockSpec((Bt, Hp), lambda b, t: (b, 0)),         # h0
                pl.BlockSpec((Hp, Hp), lambda b, t: (0, 0),
                             pipeline_mode=pl.Buffered(1)),          # W_hh^T
            ],
            out_specs=pl.BlockSpec((C, Bt, Hp), lambda b, t: (t, b, 0)),
            scratch_shapes=[pltpu.VMEM((Bt, Hp), jnp.float32)],      # carried h
        ),
        compiler_params=pltpu.CompilerParams(
            dimension_semantics=("parallel", "arbitrary"),  # batch ∥, time serial
            vmem_limit_bytes=vmem_limit,
        ),
    )(proj_p, h0_p, whh_t)

    out = out_p[:T, :B, :H]
    h_last = out[-1]  # final hidden is just the last stacked output
    return out, h_last


def _reference(x, weight_ih, weight_hh, bias_ih, bias_hh, hx=None):
    T, B, D = x.shape
    H = weight_ih.shape[0]
    if hx is None:
        hx = jnp.zeros((B, H), dtype=x.dtype)
    outs = []
    h = hx
    for t in range(T):
        h = jax.nn.relu(x[t] @ weight_ih.T + bias_ih + h @ weight_hh.T + bias_hh)
        outs.append(h)
    return jnp.stack(outs, axis=0), h


if __name__ == "__main__":
    key = jax.random.PRNGKey(0)
    T, B, D, H = 8, 4, 16, 32

    k1, k2, k3, k4, k5 = jax.random.split(key, 5)
    # Deterministic init matching nn.init.uniform_(-0.1, 0.1) distributionally.
    weight_ih = jax.random.uniform(k1, (H, D), jnp.float32, -0.1, 0.1)
    weight_hh = jax.random.uniform(k2, (H, H), jnp.float32, -0.1, 0.1)
    bias_ih = jax.random.uniform(k3, (H,), jnp.float32, -0.1, 0.1)
    bias_hh = jax.random.uniform(k4, (H,), jnp.float32, -0.1, 0.1)
    x = jax.random.normal(k5, (T, B, D), jnp.float32)

    ref_out, ref_h = _reference(x, weight_ih, weight_hh, bias_ih, bias_hh)

    # Default fast path: bf16 MXU operands, fp32 accumulation.
    out, h_last = simple_rnn_n(x, weight_ih, weight_hh, bias_ih, bias_hh)
    jax.block_until_ready((out, h_last))
    assert out.shape == (T, B, H) and h_last.shape == (B, H)
    assert jnp.allclose(out, ref_out, atol=2e-2, rtol=2e-2)
    assert jnp.allclose(h_last, ref_h, atol=2e-2, rtol=2e-2)

    # fp32 fallback path (accuracy-sensitive): matches the reference tightly.
    out32, h32 = simple_rnn_n(x, weight_ih, weight_hh, bias_ih, bias_hh,
                              use_bf16_matmul=False)
    jax.block_until_ready((out32, h32))
    assert jnp.allclose(out32, ref_out, atol=1e-5, rtol=1e-5)
    assert jnp.allclose(h32, ref_h, atol=1e-5, rtol=1e-5)

    print("KERNEL_OK")
</pallas_src>

<mosaic_0001>
module attributes {stable_mosaic.version = 11 : i64} {
  func.func @_rnn_recurrence_kernel(%arg0: i32, %arg1: i32, %arg2: memref<8x8x128xf32, #tpu.memory_space<vmem>>, %arg3: memref<8x128xf32, #tpu.memory_space<vmem>>, %arg4: memref<128x128xbf16, #tpu.memory_space<vmem>>, %arg5: memref<8x8x128xf32, #tpu.memory_space<vmem>>, %arg6: memref<8x128xf32, #tpu.memory_space<vmem>>) attributes {dimension_semantics = [#tpu.dimension_semantics<parallel>, #tpu.dimension_semantics<arbitrary>], iteration_bounds = array<i64: 1, 1>, scalar_prefetch = 0 : i64, scratch_operands = 1 : i64, tpu.core_type = #tpu.core_type<tc>, window_params = [{transform_indices = @transform_0, window_bounds = array<i64: 8, 8, 128>}, {transform_indices = @transform_1, window_bounds = array<i64: 8, 128>}, {pipeline_mode = #tpu.pipeline_mode<synchronous>, transform_indices = @transform_2, window_bounds = array<i64: 128, 128>}, {transform_indices = @transform_3, window_bounds = array<i64: 8, 8, 128>}]} {
    %c0_i32 = arith.constant 0 : i32
    %0 = arith.cmpi eq, %arg1, %c0_i32 : i32
    %1 = arith.extui %0 : i1 to i32
    %c0_i32_0 = arith.constant 0 : i32
    %2 = arith.cmpi ne, %1, %c0_i32_0 : i32
    scf.if %2 {
      %c0_68 = arith.constant 0 : index
      %c0_69 = arith.constant 0 : index
      %109 = vector.load %arg3[%c0_68, %c0_69] : memref<8x128xf32, #tpu.memory_space<vmem>>, vector<8x128xf32>
      %c0_70 = arith.constant 0 : index
      %c0_71 = arith.constant 0 : index
      %110 = vector.load %arg6[%c0_70, %c0_71] : memref<8x128xf32, #tpu.memory_space<vmem>>, vector<8x128xf32>
      tpu.vector_store %arg6[%c0_70, %c0_71], %109 {strides = array<i32>} : memref<8x128xf32, #tpu.memory_space<vmem>>, vector<8x128xf32>,
    } else {
    }
    %c0 = arith.constant 0 : index
    %c0_1 = arith.constant 0 : index
    %3 = vector.load %arg6[%c0, %c0_1] : memref<8x128xf32, #tpu.memory_space<vmem>>, vector<8x128xf32>
    %c0_i32_2 = arith.constant 0 : i32
    %4 = arith.index_cast %c0_i32_2 : i32 to index
    %c0_3 = arith.constant 0 : index
    %c0_4 = arith.constant 0 : index
    %5 = vector.load %arg2[%4, %c0_3, %c0_4] : memref<8x8x128xf32, #tpu.memory_space<vmem>>, vector<1x8x128xf32>
    %6 = vector.shape_cast %5 : vector<1x8x128xf32> to vector<8x128xf32>
    %7 = arith.truncf %3 : vector<8x128xf32> to vector<8x128xbf16>
    %c0_5 = arith.constant 0 : index
    %c0_6 = arith.constant 0 : index
    %8 = vector.load %arg4[%c0_5, %c0_6] : memref<128x128xbf16, #tpu.memory_space<vmem>>, vector<128x128xbf16>
    %cst = arith.constant dense<0.000000e+00> : vector<8x128xf32>
    %9 = tpu.matmul %7, %8, %cst {dimension_numbers = #tpu.dot_dimension_numbers<[1], [0], [0], [1], [0, 0, 1, 1], [], []>} : vector<8x128xbf16>, vector<128x128xbf16>, vector<8x128xf32> -> vector<8x128xf32>
    %10 = arith.addf %6, %9 : vector<8x128xf32>
    %cst_7 = arith.constant 0.000000e+00 : f32
    %11 = vector.broadcast %cst_7 : f32 to vector<8x128xf32>
    %12 = arith.maximumf %10, %11 : vector<8x128xf32>
    %13 = arith.index_cast %c0_i32_2 : i32 to index
    %c0_8 = arith.constant 0 : index
    %c0_9 = arith.constant 0 : index
    %14 = vector.load %arg5[%13, %c0_8, %c0_9] : memref<8x8x128xf32, #tpu.memory_space<vmem>>, vector<1x8x128xf32>
    %15 = vector.shape_cast %14 : vector<1x8x128xf32> to vector<8x128xf32>
    %16 = vector.shape_cast %12 : vector<8x128xf32> to vector<1x8x128xf32>
    tpu.vector_store %arg5[%13, %c0_8, %c0_9], %16 {strides = array<i32>} : memref<8x8x128xf32, #tpu.memory_space<vmem>>, vector<1x8x128xf32>,
    %c1_i32 = arith.constant 1 : i32
    %17 = arith.index_cast %c1_i32 : i32 to index
    %c0_10 = arith.constant 0 : index
    %c0_11 = arith.constant 0 : index
    %18 = vector.load %arg2[%17, %c0_10, %c0_11] : memref<8x8x128xf32, #tpu.memory_space<vmem>>, vector<1x8x128xf32>
    %19 = vector.shape_cast %18 : vector<1x8x128xf32> to vector<8x128xf32>
    %20 = arith.truncf %12 : vector<8x128xf32> to vector<8x128xbf16>
    %c0_12 = arith.constant 0 : index
    %c0_13 = arith.constant 0 : index
    %21 = vector.load %arg4[%c0_12, %c0_13] : memref<128x128xbf16, #tpu.memory_space<vmem>>, vector<128x128xbf16>
    %cst_14 = arith.constant dense<0.000000e+00> : vector<8x128xf32>
    %22 = tpu.matmul %20, %21, %cst_14 {dimension_numbers = #tpu.dot_dimension_numbers<[1], [0], [0], [1], [0, 0, 1, 1], [], []>} : vector<8x128xbf16>, vector<128x128xbf16>, vector<8x128xf32> -> vector<8x128xf32>
    %23 = arith.addf %19, %22 : vector<8x128xf32>
    %cst_15 = arith.constant 0.000000e+00 : f32
    %24 = vector.broadcast %cst_15 : f32 to vector<8x128xf32>
    %25 = arith.maximumf %23, %24 : vector<8x128xf32>
    %26 = arith.index_cast %c1_i32 : i32 to index
    %c0_16 = arith.constant 0 : index
    %c0_17 = arith.constant 0 : index
    %27 = vector.load %arg5[%26, %c0_16, %c0_17] : memref<8x8x128xf32, #tpu.memory_space<vmem>>, vector<1x8x128xf32>
    %28 = vector.shape_cast %27 : vector<1x8x128xf32> to vector<8x128xf32>
    %29 = vector.shape_cast %25 : vector<8x128xf32> to vector<1x8x128xf32>
    tpu.vector_store %arg5[%26, %c0_16, %c0_17], %29 {strides = array<i32>} : memref<8x8x128xf32, #tpu.memory_space<vmem>>, vector<1x8x128xf32>,
    %c2_i32 = arith.constant 2 : i32
    %30 = arith.index_cast %c2_i32 : i32 to index
    %c0_18 = arith.constant 0 : index
    %c0_19 = arith.constant 0 : index
    %31 = vector.load %arg2[%30, %c0_18, %c0_19] : memref<8x8x128xf32, #tpu.memory_space<vmem>>, vector<1x8x128xf32>
    %32 = vector.shape_cast %31 : vector<1x8x128xf32> to vector<8x128xf32>
    %33 = arith.truncf %25 : vector<8x128xf32> to vector<8x128xbf16>
    %c0_20 = arith.constant 0 : index
    %c0_21 = arith.constant 0 : index
    %34 = vector.load %arg4[%c0_20, %c0_21] : memref<128x128xbf16, #tpu.memory_space<vmem>>, vector<128x128xbf16>
    %cst_22 = arith.constant dense<0.000000e+00> : vector<8x128xf32>
    %35 = tpu.matmul %33, %34, %cst_22 {dimension_numbers = #tpu.dot_dimension_numbers<[1], [0], [0], [1], [0, 0, 1, 1], [], []>} : vector<8x128xbf16>, vector<128x128xbf16>, vector<8x128xf32> -> vector<8x128xf32>
    %36 = arith.addf %32, %35 : vector<8x128xf32>
    %cst_23 = arith.constant 0.000000e+00 : f32
    %37 = vector.broadcast %cst_23 : f32 to vector<8x128xf32>
    %38 = arith.maximumf %36, %37 : vector<8x128xf32>
    %39 = arith.index_cast %c2_i32 : i32 to index
    %c0_24 = arith.constant 0 : index
    %c0_25 = arith.constant 0 : index
    %40 = vector.load %arg5[%39, %c0_24, %c0_25] : memref<8x8x128xf32, #tpu.memory_space<vmem>>, vector<1x8x128xf32>
    %41 = vector.shape_cast %40 : vector<1x8x128xf32> to vector<8x128xf32>
    %42 = vector.shape_cast %38 : vector<8x128xf32> to vector<1x8x128xf32>
    tpu.vector_store %arg5[%39, %c0_24, %c0_25], %42 {strides = array<i32>} : memref<8x8x128xf32, #tpu.memory_space<vmem>>, vector<1x8x128xf32>,
    %c3_i32 = arith.constant 3 : i32
    %43 = arith.index_cast %c3_i32 : i32 to index
    %c0_26 = arith.constant 0 : index
    %c0_27 = arith.constant 0 : index
    %44 = vector.load %arg2[%43, %c0_26, %c0_27] : memref<8x8x128xf32, #tpu.memory_space<vmem>>, vector<1x8x128xf32>
    %45 = vector.shape_cast %44 : vector<1x8x128xf32> to vector<8x128xf32>
    %46 = arith.truncf %38 : vector<8x128xf32> to vector<8x128xbf16>
    %c0_28 = arith.constant 0 : index
    %c0_29 = arith.constant 0 : index
    %47 = vector.load %arg4[%c0_28, %c0_29] : memref<128x128xbf16, #tpu.memory_space<vmem>>, vector<128x128xbf16>
    %cst_30 = arith.constant dense<0.000000e+00> : vector<8x128xf32>
    %48 = tpu.matmul %46, %47, %cst_30 {dimension_numbers = #tpu.dot_dimension_numbers<[1], [0], [0], [1], [0, 0, 1, 1], [], []>} : vector<8x128xbf16>, vector<128x128xbf16>, vector<8x128xf32> -> vector<8x128xf32>
    %49 = arith.addf %45, %48 : vector<8x128xf32>
    %cst_31 = arith.constant 0.000000e+00 : f32
    %50 = vector.broadcast %cst_31 : f32 to vector<8x128xf32>
    %51 = arith.maximumf %49, %50 : vector<8x128xf32>
    %52 = arith.index_cast %c3_i32 : i32 to index
    %c0_32 = arith.constant 0 : index
    %c0_33 = arith.constant 0 : index
    %53 = vector.load %arg5[%52, %c0_32, %c0_33] : memref<8x8x128xf32, #tpu.memory_space<vmem>>, vector<1x8x128xf32>
    %54 = vector.shape_cast %53 : vector<1x8x128xf32> to vector<8x128xf32>
    %55 = vector.shape_cast %51 : vector<8x128xf32> to vector<1x8x128xf32>
    tpu.vector_store %arg5[%52, %c0_32, %c0_33], %55 {strides = array<i32>} : memref<8x8x128xf32, #tpu.memory_space<vmem>>, vector<1x8x128xf32>,
    %c4_i32 = arith.constant 4 : i32
    %56 = arith.index_cast %c4_i32 : i32 to index
    %c0_34 = arith.constant 0 : index
    %c0_35 = arith.constant 0 : index
    %57 = vector.load %arg2[%56, %c0_34, %c0_35] : memref<8x8x128xf32, #tpu.memory_space<vmem>>, vector<1x8x128xf32>
    %58 = vector.shape_cast %57 : vector<1x8x128xf32> to vector<8x128xf32>
    %59 = arith.truncf %51 : vector<8x128xf32> to vector<8x128xbf16>
    %c0_36 = arith.constant 0 : index
    %c0_37 = arith.constant 0 : index
    %60 = vector.load %arg4[%c0_36, %c0_37] : memref<128x128xbf16, #tpu.memory_space<vmem>>, vector<128x128xbf16>
    %cst_38 = arith.constant dense<0.000000e+00> : vector<8x128xf32>
    %61 = tpu.matmul %59, %60, %cst_38 {dimension_numbers = #tpu.dot_dimension_numbers<[1], [0], [0], [1], [0, 0, 1, 1], [], []>} : vector<8x128xbf16>, vector<128x128xbf16>, vector<8x128xf32> -> vector<8x128xf32>
    %62 = arith.addf %58, %61 : vector<8x128xf32>
    %cst_39 = arith.constant 0.000000e+00 : f32
    %63 = vector.broadcast %cst_39 : f32 to vector<8x128xf32>
    %64 = arith.maximumf %62, %63 : vector<8x128xf32>
    %65 = arith.index_cast %c4_i32 : i32 to index
    %c0_40 = arith.constant 0 : index
    %c0_41 = arith.constant 0 : index
    %66 = vector.load %arg5[%65, %c0_40, %c0_41] : memref<8x8x128xf32, #tpu.memory_space<vmem>>, vector<1x8x128xf32>
    %67 = vector.shape_cast %66 : vector<1x8x128xf32> to vector<8x128xf32>
    %68 = vector.shape_cast %64 : vector<8x128xf32> to vector<1x8x128xf32>
    tpu.vector_store %arg5[%65, %c0_40, %c0_41], %68 {strides = array<i32>} : memref<8x8x128xf32, #tpu.memory_space<vmem>>, vector<1x8x128xf32>,
    %c5_i32 = arith.constant 5 : i32
    %69 = arith.index_cast %c5_i32 : i32 to index
    %c0_42 = arith.constant 0 : index
    %c0_43 = arith.constant 0 : index
    %70 = vector.load %arg2[%69, %c0_42, %c0_43] : memref<8x8x128xf32, #tpu.memory_space<vmem>>, vector<1x8x128xf32>
    %71 = vector.shape_cast %70 : vector<1x8x128xf32> to vector<8x128xf32>
    %72 = arith.truncf %64 : vector<8x128xf32> to vector<8x128xbf16>
    %c0_44 = arith.constant 0 : index
    %c0_45 = arith.constant 0 : index
    %73 = vector.load %arg4[%c0_44, %c0_45] : memref<128x128xbf16, #tpu.memory_space<vmem>>, vector<128x128xbf16>
    %cst_46 = arith.constant dense<0.000000e+00> : vector<8x128xf32>
    %74 = tpu.matmul %72, %73, %cst_46 {dimension_numbers = #tpu.dot_dimension_numbers<[1], [0], [0], [1], [0, 0, 1, 1], [], []>} : vector<8x128xbf16>, vector<128x128xbf16>, vector<8x128xf32> -> vector<8x128xf32>
    %75 = arith.addf %71, %74 : vector<8x128xf32>
    %cst_47 = arith.constant 0.000000e+00 : f32
    %76 = vector.broadcast %cst_47 : f32 to vector<8x128xf32>
    %77 = arith.maximumf %75, %76 : vector<8x128xf32>
    %78 = arith.index_cast %c5_i32 : i32 to index
    %c0_48 = arith.constant 0 : index
    %c0_49 = arith.constant 0 : index
    %79 = vector.load %arg5[%78, %c0_48, %c0_49] : memref<8x8x128xf32, #tpu.memory_space<vmem>>, vector<1x8x128xf32>
    %80 = vector.shape_cast %79 : vector<1x8x128xf32> to vector<8x128xf32>
    %81 = vector.shape_cast %77 : vector<8x128xf32> to vector<1x8x128xf32>
    tpu.vector_store %arg5[%78, %c0_48, %c0_49], %81 {strides = array<i32>} : memref<8x8x128xf32, #tpu.memory_space<vmem>>, vector<1x8x128xf32>,
    %c6_i32 = arith.constant 6 : i32
    %82 = arith.index_cast %c6_i32 : i32 to index
    %c0_50 = arith.constant 0 : index
    %c0_51 = arith.constant 0 : index
    %83 = vector.load %arg2[%82, %c0_50, %c0_51] : memref<8x8x128xf32, #tpu.memory_space<vmem>>, vector<1x8x128xf32>
    %84 = vector.shape_cast %83 : vector<1x8x128xf32> to vector<8x128xf32>
    %85 = arith.truncf %77 : vector<8x128xf32> to vector<8x128xbf16>
    %c0_52 = arith.constant 0 : index
    %c0_53 = arith.constant 0 : index
    %86 = vector.load %arg4[%c0_52, %c0_53] : memref<128x128xbf16, #tpu.memory_space<vmem>>, vector<128x128xbf16>
    %cst_54 = arith.constant dense<0.000000e+00> : vector<8x128xf32>
    %87 = tpu.matmul %85, %86, %cst_54 {dimension_numbers = #tpu.dot_dimension_numbers<[1], [0], [0], [1], [0, 0, 1, 1], [], []>} : vector<8x128xbf16>, vector<128x128xbf16>, vector<8x128xf32> -> vector<8x128xf32>
    %88 = arith.addf %84, %87 : vector<8x128xf32>
    %cst_55 = arith.constant 0.000000e+00 : f32
    %89 = vector.broadcast %cst_55 : f32 to vector<8x128xf32>
    %90 = arith.maximumf %88, %89 : vector<8x128xf32>
    %91 = arith.index_cast %c6_i32 : i32 to index
    %c0_56 = arith.constant 0 : index
    %c0_57 = arith.constant 0 : index
    %92 = vector.load %arg5[%91, %c0_56, %c0_57] : memref<8x8x128xf32, #tpu.memory_space<vmem>>, vector<1x8x128xf32>
    %93 = vector.shape_cast %92 : vector<1x8x128xf32> to vector<8x128xf32>
    %94 = vector.shape_cast %90 : vector<8x128xf32> to vector<1x8x128xf32>
    tpu.vector_store %arg5[%91, %c0_56, %c0_57], %94 {strides = array<i32>} : memref<8x8x128xf32, #tpu.memory_space<vmem>>, vector<1x8x128xf32>,
    %c7_i32 = arith.constant 7 : i32
    %95 = arith.index_cast %c7_i32 : i32 to index
    %c0_58 = arith.constant 0 : index
    %c0_59 = arith.constant 0 : index
    %96 = vector.load %arg2[%95, %c0_58, %c0_59] : memref<8x8x128xf32, #tpu.memory_space<vmem>>, vector<1x8x128xf32>
    %97 = vector.shape_cast %96 : vector<1x8x128xf32> to vector<8x128xf32>
    %98 = arith.truncf %90 : vector<8x128xf32> to vector<8x128xbf16>
    %c0_60 = arith.constant 0 : index
    %c0_61 = arith.constant 0 : index
    %99 = vector.load %arg4[%c0_60, %c0_61] : memref<128x128xbf16, #tpu.memory_space<vmem>>, vector<128x128xbf16>
    %cst_62 = arith.constant dense<0.000000e+00> : vector<8x128xf32>
    %100 = tpu.matmul %98, %99, %cst_62 {dimension_numbers = #tpu.dot_dimension_numbers<[1], [0], [0], [1], [0, 0, 1, 1], [], []>} : vector<8x128xbf16>, vector<128x128xbf16>, vector<8x128xf32> -> vector<8x128xf32>
    %101 = arith.addf %97, %100 : vector<8x128xf32>
    %cst_63 = arith.constant 0.000000e+00 : f32
    %102 = vector.broadcast %cst_63 : f32 to vector<8x128xf32>
    %103 = arith.maximumf %101, %102 : vector<8x128xf32>
    %104 = arith.index_cast %c7_i32 : i32 to index
    %c0_64 = arith.constant 0 : index
    %c0_65 = arith.constant 0 : index
    %105 = vector.load %arg5[%104, %c0_64, %c0_65] : memref<8x8x128xf32, #tpu.memory_space<vmem>>, vector<1x8x128xf32>
    %106 = vector.shape_cast %105 : vector<1x8x128xf32> to vector<8x128xf32>
    %107 = vector.shape_cast %103 : vector<8x128xf32> to vector<1x8x128xf32>
    tpu.vector_store %arg5[%104, %c0_64, %c0_65], %107 {strides = array<i32>} : memref<8x8x128xf32, #tpu.memory_space<vmem>>, vector<1x8x128xf32>,
    %c8_i32 = arith.constant 8 : i32
    %c0_66 = arith.constant 0 : index
    %c0_67 = arith.constant 0 : index
    %108 = vector.load %arg6[%c0_66, %c0_67] : memref<8x128xf32, #tpu.memory_space<vmem>>, vector<8x128xf32>
    tpu.vector_store %arg6[%c0_66, %c0_67], %103 {strides = array<i32>} : memref<8x128xf32, #tpu.memory_space<vmem>>, vector<8x128xf32>,
    return
  }
  func.func @transform_0(%arg0: i32, %arg1: i32) -> (i32, i32, i32) {
    %c0_i32 = arith.constant 0 : i32
    %c0_i32_0 = arith.constant 0 : i32
    return %arg1, %arg0, %c0_i32 : i32, i32, i32
  }
  func.func @transform_1(%arg0: i32, %arg1: i32) -> (i32, i32) {
    %c0_i32 = arith.constant 0 : i32
    %c0_i32_0 = arith.constant 0 : i32
    return %arg0, %c0_i32 : i32, i32
  }
  func.func @transform_2(%arg0: i32, %arg1: i32) -> (i32, i32) {
    %c0_i32 = arith.constant 0 : i32
    %c0_i32_0 = arith.constant 0 : i32
    %c0_i32_1 = arith.constant 0 : i32
    return %c0_i32, %c0_i32_0 : i32, i32
  }
  func.func @transform_3(%arg0: i32, %arg1: i32) -> (i32, i32, i32) {
    %c0_i32 = arith.constant 0 : i32
    %c0_i32_0 = arith.constant 0 : i32
    return %arg1, %arg0, %c0_i32 : i32, i32, i32
  }
}

</mosaic_0001>

<bundles_post_ra>
// kernel: simple_rnn_n.1
= control target key start
LH: loop header
LB: loop body
LE: loop exit
PB: predicated region body
PF: predicated region fallthrough
CT: control target
= control target key end

     0   :  { %v1289_v0 = vmov 0.0   ;;  %vm1290_vm0 = vmmov 0   ;;  %s1634_s2 = inlined_call_operand.vmem [shape: bf16[128,128], index: 2, kind: input, shape index: {}]   ;;  %s1635_s1 = inlined_call_operand.vmem [shape: f32[8,128], index: 1, kind: input, shape index: {}]   ;;  %s1636_s0 = inlined_call_operand.vmem [shape: f32[8,8,128], index: 0, kind: input, shape index: {}]   ;;  %s1637_s3 = inlined_call_operand.vmem [shape: f32[8,8,128], index: 3, kind: output, shape index: {}]  }
   0x1   :  { %1063 = vmatprep.subr.bf16.mxu0 %v1289_v0  ;;  %v1225_v1 = vld [vmem:[%s1634_s2] sm:$0xff]   ;;  %1079 = vmatprep.mubr.msk.bf16.mxu0 %vm1290_vm0, %v1289_v0  ;;  %v1226_v2 = vld [vmem:[%s1634_s2 + $0x8] sm:$0xff]   ;;  %v1227_v3 = vld [vmem:[%s1634_s2 + $0x10] sm:$0xff]  }
   0x2   :  { %1083 = vmatprep.subr.bf16.mxu1 %v1289_v0  ;;  %1099 = vmatprep.mubr.msk.bf16.mxu1 %vm1290_vm0, %v1289_v0  ;;  %v1233_v4 = vld [vmem:[%s1634_s2] sm:$0xff]   ;;  %v1228_v5 = vld [vmem:[%s1634_s2 + $0x18] sm:$0xff]   ;;  %v1234_v6 = vld [vmem:[%s1634_s2 + $0x8] sm:$0xff]  }
   0x3   :  { %1064 = vmatpush3.bf16.msra.mxu0 %v1225_v1  ;;  %1084 = vmatpush3.bf16.msra.mxu1 %v1233_v4  ;;  %v1229_v7 = vld [vmem:[%s1634_s2 + $0x20] sm:$0xff]   ;;  %v1235_v8 = vld [vmem:[%s1634_s2 + $0x10] sm:$0xff]   ;;  %v1230_v9 = vld [vmem:[%s1634_s2 + $0x28] sm:$0xff]  }
   0x4   :  { %1065 = vmatprep.subr.bf16.mxu0 %v1289_v0  ;;  %1085 = vmatprep.subr.bf16.mxu1 %v1289_v0  ;;  %v1236_v10 = vld [vmem:[%s1634_s2 + $0x18] sm:$0xff]   ;;  %v1231_v11 = vld [vmem:[%s1634_s2 + $0x30] sm:$0xff]   ;;  %v1237_v12 = vld [vmem:[%s1634_s2 + $0x20] sm:$0xff]  }
   0x5   :  { %v1232_v13 = vld [vmem:[%s1634_s2 + $0x38] sm:$0xff]   ;;  %v19_v14 = vld [vmem:[%s1635_s1] sm:$0xff]  ;;  %v1238_v15 = vld [vmem:[%s1634_s2 + $0x28] sm:$0xff]  }
   0x6   :  { %v23_v16 = vpack.c.bf16 %v19_v14, %v19_v14  ;;  %v1239_v17 = vld [vmem:[%s1634_s2 + $0x30] sm:$0xff]   ;;  %v1240_v18 = vld [vmem:[%s1634_s2 + $0x38] sm:$0xff]   ;;  %v1241_v19 = vld [vmem:[%s1634_s2] sm:$0xff]  }
   0x7   :  { %1066 = vmatpush3.bf16.msra.mxu0 %v1226_v2  ;;  %1086 = vmatpush3.bf16.msra.mxu1 %v1234_v6  ;;  %v1242_v20 = vld [vmem:[%s1634_s2 + $0x8] sm:$0xff]   ;;  %v1243_v21 = vld [vmem:[%s1634_s2 + $0x10] sm:$0xff]   ;;  %v1244_v22 = vld [vmem:[%s1634_s2 + $0x18] sm:$0xff]  }
   0x8   :  { %1067 = vmatprep.subr.bf16.mxu0 %v1289_v0  ;;  %1087 = vmatprep.subr.bf16.mxu1 %v1289_v0  ;;  %v1245_v23 = vld [vmem:[%s1634_s2 + $0x20] sm:$0xff]   ;;  %v1246_v24 = vld [vmem:[%s1634_s2 + $0x28] sm:$0xff]   ;;  %v1247_v33 = vld [vmem:[%s1634_s2 + $0x30] sm:$0xff]  }
   0x9   :  { %v22_v25 = vld [vmem:[%s1636_s0] sm:$0xff]  ;;  %v1248_v34 = vld [vmem:[%s1634_s2 + $0x38] sm:$0xff]   ;;  %v1250_v36 = vld [vmem:[%s1634_s2 + $0x8] sm:$0xff]  }
   0xa   :  { %v1249_v35 = vld [vmem:[%s1634_s2] sm:$0xff]   ;;  %v1251_v37 = vld [vmem:[%s1634_s2 + $0x10] sm:$0xff]   ;;  %v1252_v38 = vld [vmem:[%s1634_s2 + $0x18] sm:$0xff]  }
   0xb   :  { %1068 = vmatpush3.bf16.msra.mxu0 %v1227_v3  ;;  %1088 = vmatpush3.bf16.msra.mxu1 %v1235_v8  ;;  %v1253_v39 = vld [vmem:[%s1634_s2 + $0x20] sm:$0xff]   ;;  %v1254_v40 = vld [vmem:[%s1634_s2 + $0x28] sm:$0xff]   ;;  %v1255_v49 = vld [vmem:[%s1634_s2 + $0x30] sm:$0xff]  }
   0xc   :  { %1069 = vmatprep.subr.bf16.mxu0 %v1289_v0  ;;  %1089 = vmatprep.subr.bf16.mxu1 %v1289_v0  ;;  %v921_v41 = vld [vmem:[%s1636_s0 + $0x8] sm:$0xff]  ;;  %v1256_v50 = vld [vmem:[%s1634_s2 + $0x38] sm:$0xff]   ;;  %v1257_v51 = vld [vmem:[%s1634_s2] sm:$0xff]  }
   0xd   :  { %v1258_v52 = vld [vmem:[%s1634_s2 + $0x8] sm:$0xff]   ;;  %v1259_v53 = vld [vmem:[%s1634_s2 + $0x10] sm:$0xff]   ;;  %v1260_v54 = vld [vmem:[%s1634_s2 + $0x18] sm:$0xff]  }
   0xe   :  { %v1261_v55 = vld [vmem:[%s1634_s2 + $0x20] sm:$0xff]   ;;  %v1262_v56 = vld [vmem:[%s1634_s2 + $0x28] sm:$0xff]   ;;  %v931_v57 = vld [vmem:[%s1636_s0 + $0x10] sm:$0xff] }
   0xf   :  { %1070 = vmatpush3.bf16.msra.mxu0 %v1228_v5  ;;  %1090 = vmatpush3.bf16.msra.mxu1 %v1236_v10  ;;  %v1263_v2 = vld [vmem:[%s1634_s2 + $0x30] sm:$0xff]   ;;  %v1264_v3 = vld [vmem:[%s1634_s2 + $0x38] sm:$0xff]   ;;  %v1265_v4 = vld [vmem:[%s1634_s2] sm:$0xff]  }
  0x10   :  { %1071 = vmatprep.subr.bf16.mxu0 %v1289_v0  ;;  %1091 = vmatprep.subr.bf16.mxu1 %v1289_v0  ;;  %v1266_v5 = vld [vmem:[%s1634_s2 + $0x8] sm:$0xff]   ;;  %v1267_v6 = vld [vmem:[%s1634_s2 + $0x10] sm:$0xff]   ;;  %v1269_v8 = vld [vmem:[%s1634_s2 + $0x20] sm:$0xff]  }
  0x11   :  { %v941_v10 = vld [vmem:[%s1636_s0 + $0x18] sm:$0xff] }
  0x13   :  { %1072 = vmatpush3.bf16.msra.mxu0 %v1229_v7  ;;  %1092 = vmatpush3.bf16.msra.mxu1 %v1237_v12  ;;  %v1268_v7 = vld [vmem:[%s1634_s2 + $0x18] sm:$0xff]  }
  0x14   :  { %1073 = vmatprep.subr.bf16.mxu0 %v1289_v0  ;;  %1093 = vmatprep.subr.bf16.mxu1 %v1289_v0 }
  0x17   :  { %1074 = vmatpush3.bf16.msra.mxu0 %v1230_v9  ;;  %1094 = vmatpush3.bf16.msra.mxu1 %v1238_v15  ;;  %v1270_v9 = vld [vmem:[%s1634_s2 + $0x28] sm:$0xff]  }
  0x18   :  { %1075 = vmatprep.subr.bf16.mxu0 %v1289_v0  ;;  %1095 = vmatprep.subr.bf16.mxu1 %v1289_v0 }
  0x1b   :  { %1076 = vmatpush3.bf16.msra.mxu0 %v1231_v11  ;;  %1096 = vmatpush3.bf16.msra.mxu1 %v1239_v17 }
  0x1c   :  { %1077 = vmatprep.subr.bf16.mxu0 %v1289_v0  ;;  %1097 = vmatprep.subr.bf16.mxu1 %v1289_v0 }
  0x1f   :  { %1078 = vmatpush3.bf16.msra.mxu0 %v1232_v13  ;;  %1098 = vmatpush3.bf16.msra.mxu1 %v1240_v18  ;;  %v1271_v18 = vld [vmem:[%s1634_s2 + $0x30] sm:$0xff]  }
  0x20   :  { %1103 = vmatprep.subr.bf16.mxu0 %v1289_v0  ;;  %1123 = vmatprep.subr.bf16.mxu1 %v1289_v0 }
  0x22   :  { %1080 = vmatmul.mubr.bf16.vlgmr.msra.gmra.mrb[0].mxu0 %v23_v16 }
  0x23   :  { %1119 = vmatprep.mubr.msk.bf16.mxu0 %vm1290_vm0, %v1289_v0  ;;  %1104 = vmatpush3.bf16.msra.mxu0 %v1241_v19  ;;  %v1272_v19 = vld [vmem:[%s1634_s2 + $0x38] sm:$0xff]  }
  0x24   :  { %1105 = vmatprep.subr.bf16.mxu0 %v1289_v0 }
  0x27   :  { %1106 = vmatpush3.bf16.msra.mxu0 %v1242_v20  ;;  %v1273_v20 = vld [vmem:[%s1634_s2] sm:$0xff]  }
  0x28   :  { %1107 = vmatprep.subr.bf16.mxu0 %v1289_v0 }
  0x2b   :  { %1108 = vmatpush3.bf16.msra.mxu0 %v1243_v21  ;;  %v1274_v21 = vld [vmem:[%s1634_s2 + $0x8] sm:$0xff]  }
  0x2c   :  { %1109 = vmatprep.subr.bf16.mxu0 %v1289_v0 }
  0x2f   :  { %1110 = vmatpush3.bf16.msra.mxu0 %v1244_v22  ;;  %v1275_v22 = vld [vmem:[%s1634_s2 + $0x10] sm:$0xff]  }
  0x30   :  { %1111 = vmatprep.subr.bf16.mxu0 %v1289_v0 }
  0x33   :  { %1112 = vmatpush3.bf16.msra.mxu0 %v1245_v23  ;;  %v1276_v23 = vld [vmem:[%s1634_s2 + $0x18] sm:$0xff]  }
  0x34   :  { %1113 = vmatprep.subr.bf16.mxu0 %v1289_v0 }
  0x37   :  { %1114 = vmatpush3.bf16.msra.mxu0 %v1246_v24  ;;  %v1277_v24 = vld [vmem:[%s1634_s2 + $0x20] sm:$0xff]  }
  0x38   :  { %1115 = vmatprep.subr.bf16.mxu0 %v1289_v0 }
  0x3b   :  { %1116 = vmatpush3.bf16.msra.mxu0 %v1247_v33 }
  0x3c   :  { %1117 = vmatprep.subr.bf16.mxu0 %v1289_v0 }
  0x3f   :  { %1118 = vmatpush3.bf16.msra.mxu0 %v1248_v34  ;;  %v1279_v34 = vld [vmem:[%s1634_s2 + $0x30] sm:$0xff]  }
  0x40   :  { %1143 = vmatprep.subr.bf16.mxu0 %v1289_v0 }
  0xf5   :  { %v122_v26 = vpop.f32.mrb[0].mxu0 }
  0xf6   :  { %v128_v27 = vadd.f32 %v122_v26, %v22_v25  ;;  %v1081_v28 = vpop.f32.mrb[1].mxu0  ;;  %v1278_v25 = vld [vmem:[%s1634_s2 + $0x28] sm:$0xff]   ;;  %v951_v26 = vld [vmem:[%s1636_s0 + $0x20] sm:$0xff] }
  0xf7   :  { %v125_v29 = vpop.f32.mrb[2].mxu0 }
  0xf8   :  { %v129_v30 = vmax.f32 %v128_v27, 0.0  ;;  %v1082_v31 = vpop.f32.mrb[3].mxu0 }
  0xfa   :  { %130 = vst [vmem:[%s1637_s3] sm:$0xff] %v129_v30  ;;  %v133_v32 = vpack.c.bf16 %v129_v30, %v129_v30 }
  0xfc   :  { %1100 = vmatmul.mubr.bf16.vlgmr.msra.gmra.mrb[0].mxu1 %v133_v32 }
  0xfd   :  { %1139 = vmatprep.mubr.msk.bf16.mxu1 %vm1290_vm0, %v1289_v0  ;;  %1124 = vmatpush3.bf16.msra.mxu1 %v1249_v35  ;;  %v1280_v35 = vld [vmem:[%s1634_s2 + $0x38] sm:$0xff]  }
  0xfe   :  { %1125 = vmatprep.subr.bf16.mxu1 %v1289_v0 }
 0x101   :  { %1126 = vmatpush3.bf16.msra.mxu1 %v1250_v36  ;;  %v1281_v36 = vld [vmem:[%s1634_s2] sm:$0xff]  }
 0x102   :  { %1127 = vmatprep.subr.bf16.mxu1 %v1289_v0 }
 0x105   :  { %1128 = vmatpush3.bf16.msra.mxu1 %v1251_v37  ;;  %v1282_v37 = vld [vmem:[%s1634_s2 + $0x8] sm:$0xff]  }
 0x106   :  { %1129 = vmatprep.subr.bf16.mxu1 %v1289_v0 }
 0x109   :  { %1130 = vmatpush3.bf16.msra.mxu1 %v1252_v38  ;;  %v1283_v38 = vld [vmem:[%s1634_s2 + $0x10] sm:$0xff]  }
 0x10a   :  { %1131 = vmatprep.subr.bf16.mxu1 %v1289_v0 }
 0x10d   :  { %1132 = vmatpush3.bf16.msra.mxu1 %v1253_v39  ;;  %v1284_v39 = vld [vmem:[%s1634_s2 + $0x18] sm:$0xff]  }
 0x10e   :  { %1133 = vmatprep.subr.bf16.mxu1 %v1289_v0 }
 0x111   :  { %1134 = vmatpush3.bf16.msra.mxu1 %v1254_v40  ;;  %v1285_v40 = vld [vmem:[%s1634_s2 + $0x20] sm:$0xff]  }
 0x112   :  { %1135 = vmatprep.subr.bf16.mxu1 %v1289_v0 }
 0x115   :  { %1136 = vmatpush3.bf16.msra.mxu1 %v1255_v49 }
 0x116   :  { %1137 = vmatprep.subr.bf16.mxu1 %v1289_v0 }
 0x119   :  { %1138 = vmatpush3.bf16.msra.mxu1 %v1256_v50  ;;  %v1287_v50 = vld [vmem:[%s1634_s2 + $0x30] sm:$0xff]  }
 0x11a   :  { %1163 = vmatprep.subr.bf16.mxu1 %v1289_v0 }
 0x1cf   :  { %v232_v42 = vpop.f32.mrb[0].mxu1 }
 0x1d0   :  { %v238_v43 = vadd.f32 %v921_v41, %v232_v42  ;;  %v1101_v44 = vpop.f32.mrb[1].mxu1  ;;  %v1286_v41 = vld [vmem:[%s1634_s2 + $0x28] sm:$0xff]  }
 0x1d1   :  { %v235_v45 = vpop.f32.mrb[2].mxu1  ;;  %v961_v42 = vld [vmem:[%s1636_s0 + $0x28] sm:$0xff] }
 0x1d2   :  { %v239_v46 = vmax.f32 %v238_v43, 0.0  ;;  %v1102_v47 = vpop.f32.mrb[3].mxu1 }
 0x1d4   :  { %930 = vst [vmem:[%s1637_s3 + $0x8] sm:$0xff] %v239_v46  ;;  %v244_v48 = vpack.c.bf16 %v239_v46, %v239_v46 }
 0x1d6   :  { %1120 = vmatmul.mubr.bf16.vlgmr.msra.gmra.mrb[4].mxu0 %v244_v48 }
 0x1d7   :  { %1159 = vmatprep.mubr.msk.bf16.mxu0 %vm1290_vm0, %v1289_v0  ;;  %1144 = vmatpush3.bf16.msra.mxu0 %v1257_v51  ;;  %v1288_v51 = vld [vmem:[%s1634_s2 + $0x38] sm:$0xff]  }
 0x1d8   :  { %1145 = vmatprep.subr.bf16.mxu0 %v1289_v0 }
 0x1db   :  { %1146 = vmatpush3.bf16.msra.mxu0 %v1258_v52  ;;  %v971_v52 = vld [vmem:[%s1636_s0 + $0x30] sm:$0xff] }
 0x1dc   :  { %1147 = vmatprep.subr.bf16.mxu0 %v1289_v0 }
 0x1df   :  { %1148 = vmatpush3.bf16.msra.mxu0 %v1259_v53 }
 0x1e0   :  { %1149 = vmatprep.subr.bf16.mxu0 %v1289_v0 }
 0x1e3   :  { %1150 = vmatpush3.bf16.msra.mxu0 %v1260_v54 }
 0x1e4   :  { %1151 = vmatprep.subr.bf16.mxu0 %v1289_v0 }
 0x1e7   :  { %1152 = vmatpush3.bf16.msra.mxu0 %v1261_v55 }
 0x1e8   :  { %1153 = vmatprep.subr.bf16.mxu0 %v1289_v0 }
 0x1eb   :  { %1154 = vmatpush3.bf16.msra.mxu0 %v1262_v56 }
 0x1ec   :  { %1155 = vmatprep.subr.bf16.mxu0 %v1289_v0 }
 0x1ef   :  { %1156 = vmatpush3.bf16.msra.mxu0 %v1263_v2 }
 0x1f0   :  { %1157 = vmatprep.subr.bf16.mxu0 %v1289_v0 }
 0x1f3   :  { %1158 = vmatpush3.bf16.msra.mxu0 %v1264_v3 }
 0x1f4   :  { %1183 = vmatprep.subr.bf16.mxu0 %v1289_v0 }
 0x2a9   :  { %v343_v58 = vpop.f32.mrb[4].mxu0 }
 0x2aa   :  { %v349_v59 = vadd.f32 %v931_v57, %v343_v58  ;;  %v1121_v60 = vpop.f32.mrb[5].mxu0 }
 0x2ab   :  { %v346_v61 = vpop.f32.mrb[6].mxu0 }
 0x2ac   :  { %v350_v62 = vmax.f32 %v349_v59, 0.0  ;;  %v1122_v63 = vpop.f32.mrb[7].mxu0  ;;  %v981_v59 = vld [vmem:[%s1636_s0 + $0x38] sm:$0xff] }
 0x2ae   :  { %940 = vst [vmem:[%s1637_s3 + $0x10] sm:$0xff] %v350_v62  ;;  %v355_v1 = vpack.c.bf16 %v350_v62, %v350_v62 }
 0x2b0   :  { %1140 = vmatmul.mubr.bf16.vlgmr.msra.gmra.mrb[4].mxu1 %v355_v1 }
 0x2b1   :  { %1179 = vmatprep.mubr.msk.bf16.mxu1 %vm1290_vm0, %v1289_v0  ;;  %1164 = vmatpush3.bf16.msra.mxu1 %v1265_v4 }
 0x2b2   :  { %1165 = vmatprep.subr.bf16.mxu1 %v1289_v0 }
 0x2b5   :  { %1166 = vmatpush3.bf16.msra.mxu1 %v1266_v5 }
 0x2b6   :  { %1167 = vmatprep.subr.bf16.mxu1 %v1289_v0 }
 0x2b9   :  { %1168 = vmatpush3.bf16.msra.mxu1 %v1267_v6 }
 0x2ba   :  { %1169 = vmatprep.subr.bf16.mxu1 %v1289_v0 }
 0x2bd   :  { %1170 = vmatpush3.bf16.msra.mxu1 %v1268_v7 }
 0x2be   :  { %1171 = vmatprep.subr.bf16.mxu1 %v1289_v0 }
 0x2c1   :  { %1172 = vmatpush3.bf16.msra.mxu1 %v1269_v8 }
 0x2c2   :  { %1173 = vmatprep.subr.bf16.mxu1 %v1289_v0 }
 0x2c5   :  { %1174 = vmatpush3.bf16.msra.mxu1 %v1270_v9 }
 0x2c6   :  { %1175 = vmatprep.subr.bf16.mxu1 %v1289_v0 }
 0x2c9   :  { %1176 = vmatpush3.bf16.msra.mxu1 %v1271_v18 }
 0x2ca   :  { %1177 = vmatprep.subr.bf16.mxu1 %v1289_v0 }
 0x2cd   :  { %1178 = vmatpush3.bf16.msra.mxu1 %v1272_v19 }
 0x2ce   :  { %1203 = vmatprep.subr.bf16.mxu1 %v1289_v0 }
 0x383   :  { %v454_v11 = vpop.f32.mrb[4].mxu1 }
 0x384   :  { %v460_v12 = vadd.f32 %v941_v10, %v454_v11  ;;  %v1141_v13 = vpop.f32.mrb[5].mxu1 }
 0x385   :  { %v457_v14 = vpop.f32.mrb[6].mxu1 }
 0x386   :  { %v461_v15 = vmax.f32 %v460_v12, 0.0  ;;  %v1142_v16 = vpop.f32.mrb[7].mxu1 }
 0x388   :  { %950 = vst [vmem:[%s1637_s3 + $0x18] sm:$0xff] %v461_v15  ;;  %v466_v17 = vpack.c.bf16 %v461_v15, %v461_v15 }
 0x38a   :  { %1160 = vmatmul.mubr.bf16.vlgmr.msra.gmra.mrb[8].mxu0 %v466_v17 }
 0x38b   :  { %1199 = vmatprep.mubr.msk.bf16.mxu0 %vm1290_vm0, %v1289_v0  ;;  %1184 = vmatpush3.bf16.msra.mxu0 %v1273_v20 }
 0x38c   :  { %1185 = vmatprep.subr.bf16.mxu0 %v1289_v0 }
 0x38f   :  { %1186 = vmatpush3.bf16.msra.mxu0 %v1274_v21 }
 0x390   :  { %1187 = vmatprep.subr.bf16.mxu0 %v1289_v0 }
 0x393   :  { %1188 = vmatpush3.bf16.msra.mxu0 %v1275_v22 }
 0x394   :  { %1189 = vmatprep.subr.bf16.mxu0 %v1289_v0 }
 0x397   :  { %1190 = vmatpush3.bf16.msra.mxu0 %v1276_v23 }
 0x398   :  { %1191 = vmatprep.subr.bf16.mxu0 %v1289_v0 }
 0x39b   :  { %1192 = vmatpush3.bf16.msra.mxu0 %v1277_v24 }
 0x39c   :  { %1193 = vmatprep.subr.bf16.mxu0 %v1289_v0 }
 0x39f   :  { %1194 = vmatpush3.bf16.msra.mxu0 %v1278_v25 }
 0x3a0   :  { %1195 = vmatprep.subr.bf16.mxu0 %v1289_v0 }
 0x3a3   :  { %1196 = vmatpush3.bf16.msra.mxu0 %v1279_v34 }
 0x3a4   :  { %1197 = vmatprep.subr.bf16.mxu0 %v1289_v0 }
 0x3a7   :  { %1198 = vmatpush3.bf16.msra.mxu0 %v1280_v35 }
 0x45d   :  { %v565_v27 = vpop.f32.mrb[8].mxu0 }
 0x45e   :  { %v571_v28 = vadd.f32 %v951_v26, %v565_v27  ;;  %v1161_v29 = vpop.f32.mrb[9].mxu0 }
 0x45f   :  { %v568_v30 = vpop.f32.mrb[10].mxu0 }
 0x460   :  { %v572_v31 = vmax.f32 %v571_v28, 0.0  ;;  %v1162_v32 = vpop.f32.mrb[11].mxu0 }
 0x462   :  { %960 = vst [vmem:[%s1637_s3 + $0x20] sm:$0xff] %v572_v31  ;;  %v577_v33 = vpack.c.bf16 %v572_v31, %v572_v31 }
 0x464   :  { %1180 = vmatmul.mubr.bf16.vlgmr.msra.gmra.mrb[8].mxu1 %v577_v33 }
 0x465   :  { %1219 = vmatprep.mubr.msk.bf16.mxu1 %vm1290_vm0, %v1289_v0  ;;  %1204 = vmatpush3.bf16.msra.mxu1 %v1281_v36 }
 0x466   :  { %1205 = vmatprep.subr.bf16.mxu1 %v1289_v0 }
 0x469   :  { %1206 = vmatpush3.bf16.msra.mxu1 %v1282_v37 }
 0x46a   :  { %1207 = vmatprep.subr.bf16.mxu1 %v1289_v0 }
 0x46d   :  { %1208 = vmatpush3.bf16.msra.mxu1 %v1283_v38 }
 0x46e   :  { %1209 = vmatprep.subr.bf16.mxu1 %v1289_v0 }
 0x471   :  { %1210 = vmatpush3.bf16.msra.mxu1 %v1284_v39 }
 0x472   :  { %1211 = vmatprep.subr.bf16.mxu1 %v1289_v0 }
 0x475   :  { %1212 = vmatpush3.bf16.msra.mxu1 %v1285_v40 }
 0x476   :  { %1213 = vmatprep.subr.bf16.mxu1 %v1289_v0 }
 0x479   :  { %1214 = vmatpush3.bf16.msra.mxu1 %v1286_v41 }
 0x47a   :  { %1215 = vmatprep.subr.bf16.mxu1 %v1289_v0 }
 0x47d   :  { %1216 = vmatpush3.bf16.msra.mxu1 %v1287_v50 }
 0x47e   :  { %1217 = vmatprep.subr.bf16.mxu1 %v1289_v0 }
 0x481   :  { %1218 = vmatpush3.bf16.msra.mxu1 %v1288_v51 }
 0x537   :  { %v676_v43 = vpop.f32.mrb[8].mxu1 }
 0x538   :  { %v682_v44 = vadd.f32 %v961_v42, %v676_v43  ;;  %v1181_v45 = vpop.f32.mrb[9].mxu1 }
 0x539   :  { %v679_v46 = vpop.f32.mrb[10].mxu1 }
 0x53a   :  { %v683_v47 = vmax.f32 %v682_v44, 0.0  ;;  %v1182_v48 = vpop.f32.mrb[11].mxu1 }
 0x53c   :  { %970 = vst [vmem:[%s1637_s3 + $0x28] sm:$0xff] %v683_v47  ;;  %v688_v49 = vpack.c.bf16 %v683_v47, %v683_v47 }
 0x53e   :  { %1200 = vmatmul.mubr.bf16.vlgmr.msra.gmra.mrb[12].mxu0 %v688_v49 }
 0x611   :  { %v787_v53 = vpop.f32.mrb[12].mxu0 }
 0x612   :  { %v793_v54 = vadd.f32 %v971_v52, %v787_v53  ;;  %v1201_v55 = vpop.f32.mrb[13].mxu0 }
 0x613   :  { %v790_v56 = vpop.f32.mrb[14].mxu0 }
 0x614   :  { %v794_v57 = vmax.f32 %v793_v54, 0.0  ;;  %v1202_v58 = vpop.f32.mrb[15].mxu0 }
 0x616   :  { %980 = vst [vmem:[%s1637_s3 + $0x30] sm:$0xff] %v794_v57  ;;  %v799_v0 = vpack.c.bf16 %v794_v57, %v794_v57 }
 0x618   :  { %1220 = vmatmul.mubr.bf16.vlgmr.msra.gmra.mrb[12].mxu1 %v799_v0 }
 0x6eb   :  { %v898_v60 = vpop.f32.mrb[12].mxu1 }
 0x6ec   :  { %v904_v61 = vadd.f32 %v981_v59, %v898_v60  ;;  %v1221_v62 = vpop.f32.mrb[13].mxu1 }
 0x6ed   :  { %v901_v63 = vpop.f32.mrb[14].mxu1 }
 0x6ee   :  { %v905_v1 = vmax.f32 %v904_v61, 0.0  ;;  %v1222_v2 = vpop.f32.mrb[15].mxu1 }
 0x6f0   :  { %990 = vst [vmem:[%s1637_s3 + $0x38] sm:$0xff] %v905_v1 }

</bundles_post_ra>
